<compile_context>
chip_gen: v7x
topology: tpu7x:2x2x1
jax: 0.10.0
libtpu: 0.0.40
codegen_flags: <defaults>
</compile_context>

<pallas_src>
import functools

import jax
import jax.numpy as jnp
from jax.experimental import pallas as pl
from jax.experimental.pallas import tpu as pltpu

_PACK = 8  # batch rows packed per 128-lane row (one sublane group)


# ----------------------------------------------------------------------------
# Kernels
# ----------------------------------------------------------------------------
def _packed_kernel(x_ref, w_ref, b_ref, g_ref, o_ref):
    """Lane-dense path: 8 batch rows per vreg row; everything full-lane."""
    xp = x_ref[...]                                   # (TN, 8*D)
    logits = jnp.dot(xp, w_ref[...],
                     preferred_element_type=jnp.float32) + b_ref[...]   # (TN, 8*C)
    # Row-wide max (>= every segment max) keeps exp in range; softmax is
    # invariant to a constant shift within each 16-lane class segment.
    m = jnp.max(logits, axis=-1, keepdims=True)
    e = jnp.exp(logits - m)
    # Segmented sum + broadcast in one tiny MXU matmul with block-diag ones.
    denom = jnp.dot(e, g_ref[...], preferred_element_type=jnp.float32)  # (TN, 8*C)
    r = pl.reciprocal(denom, approx=True)             # EUP slot
    r = r * (2.0 - denom * r)                         # 1 Newton step -> ~f32 accurate
    o_ref[...] = (e * r).astype(o_ref.dtype)


def _rowwise_kernel(x_ref, w_ref, b_ref, o_ref):
    """Generic fallback: one batch row per sublane row (C in lanes)."""
    logits = jnp.dot(x_ref[...], w_ref[...],
                     preferred_element_type=jnp.float32) + b_ref[...]   # (TM, C)
    m = jnp.max(logits, axis=-1, keepdims=True)
    e = jnp.exp(logits - m)
    denom = jnp.sum(e, axis=-1, keepdims=True)
    r = pl.reciprocal(denom, approx=True)
    r = r * (2.0 - denom * r)
    o_ref[...] = (e * r).astype(o_ref.dtype)


# ----------------------------------------------------------------------------
# Wrappers
# ----------------------------------------------------------------------------
def _forward_packed(x, w_t, b, *, tm, sem):
    B, D = x.shape
    C = w_t.shape[1]
    P = _PACK

    # Only a tiny (<=7 row) pad when B is not a multiple of 8 -- the full
    # batch is never copied for ragged-in-TM sizes (Pallas masks the boundary
    # block instead).
    B_pad = ((B + P - 1) // P) * P
    x_in = x if B_pad == B else jnp.pad(x, ((0, B_pad - B), (0, 0)))
    R = B_pad // P                                    # packed rows
    xp = x_in.reshape(R, P * D)                       # free (contiguous) reshape

    # Block-diagonal weight / segment-sum matrices (tiny, built once per call).
    w_big = jnp.kron(jnp.eye(P, dtype=w_t.dtype), w_t)                    # (P*D, P*C)
    b_big = jnp.tile(b, P).reshape(1, P * C)                              # (1,   P*C)
    g = jnp.kron(jnp.eye(P, dtype=x.dtype), jnp.ones((C, C), x.dtype))    # (P*C, P*C)

    # Packed-row tile: tm batch rows == tm // P packed rows.
    tn = tm // P
    if tn >= R:
        tn = R                                        # single block == full array dim
    else:
        tn = max(8, (tn // 8) * 8)                    # (8,128)-legal when tiling
        if tn >= R:
            tn = R
    n_tiles = pl.cdiv(R, tn)                          # ragged last block -> masked

    out = pl.pallas_call(
        _packed_kernel,
        out_shape=jax.ShapeDtypeStruct((R, P * C), x.dtype),
        grid_spec=pl.GridSpec(
            grid=(n_tiles,),
            in_specs=[
                pl.BlockSpec((tn, P * D), lambda i: (i, 0)),      # x: streamed
                pl.BlockSpec((P * D, P * C), lambda i: (0, 0)),   # W_big: resident
                pl.BlockSpec((1, P * C), lambda i: (0, 0)),       # bias: resident
                pl.BlockSpec((P * C, P * C), lambda i: (0, 0)),   # G: resident
            ],
            out_specs=pl.BlockSpec((tn, P * C), lambda i: (i, 0)),
        ),
        compiler_params=pltpu.CompilerParams(dimension_semantics=(sem,)),
    )(xp, w_big, b_big, g)

    out = out.reshape(B_pad, C)                       # free reshape back to (B_pad, C)
    return out if B_pad == B else out[:B]


def _forward_rowwise(x, w_t, b, *, tm, sem):
    B, D = x.shape
    C = w_t.shape[1]
    b2 = b.reshape(1, C)

    tm_eff = tm
    if tm_eff >= B:
        tm_eff = B
    else:
        tm_eff = max(8, (tm_eff // 8) * 8)
        if tm_eff >= B:
            tm_eff = B
    n_tiles = pl.cdiv(B, tm_eff)                      # no pad; boundary block masked

    return pl.pallas_call(
        _rowwise_kernel,
        out_shape=jax.ShapeDtypeStruct((B, C), x.dtype),
        grid_spec=pl.GridSpec(
            grid=(n_tiles,),
            in_specs=[
                pl.BlockSpec((tm_eff, D), lambda i: (i, 0)),      # x: streamed
                pl.BlockSpec((D, C), lambda i: (0, 0)),           # W: resident
                pl.BlockSpec((1, C), lambda i: (0, 0)),           # b: resident
            ],
            out_specs=pl.BlockSpec((tm_eff, C), lambda i: (i, 0)),
        ),
        compiler_params=pltpu.CompilerParams(dimension_semantics=(sem,)),
    )(x, w_t, b2)


@functools.partial(jax.jit, static_argnames=("tm", "core_parallel"))
def model_c_to_y(x, w_t, b, *, tm=8192, core_parallel=False):
    """softmax(x @ w_t + b, axis=1).

    x: (B, D) f32, w_t: (D, C) f32 (pre-transposed nn.Linear weight), b: (C,) f32.
    tm: batch rows per grid step.  core_parallel=True requests CORE_PARALLEL
    grid semantics (real dual-TensorCore sharding on v7x); default PARALLEL is
    portable across v5e/v6e/v7x.
    """
    B, D = x.shape
    C = w_t.shape[1]
    sem = pltpu.CORE_PARALLEL if core_parallel else pltpu.PARALLEL
    if (_PACK * D) % 128 == 0 and (_PACK * C) % 128 == 0:
        return _forward_packed(x, w_t, b, tm=tm, sem=sem)
    return _forward_rowwise(x, w_t, b, tm=tm, sem=sem)


# ----------------------------------------------------------------------------
# Self-test
# ----------------------------------------------------------------------------
if __name__ == "__main__":
    key = jax.random.PRNGKey(0)
    k_x, k_w, k_b = jax.random.split(key, 3)

    input_dim, num_classes = 32, 16
    bound = 1.0 / (input_dim ** 0.5)
    w_t = jax.random.uniform(k_w, (input_dim, num_classes),
                             minval=-bound, maxval=bound, dtype=jnp.float32)
    b = jax.random.uniform(k_b, (num_classes,),
                           minval=-bound, maxval=bound, dtype=jnp.float32)

    def reference(x, w, bias):
        return jax.nn.softmax(x @ w + bias[None, :], axis=1)

    # 1) Small batch: single full-block lane-dense path.
    x1 = jax.random.normal(k_x, (64, input_dim), dtype=jnp.float32)
    o1 = jax.block_until_ready(model_c_to_y(x1, w_t, b))
    assert o1.shape == (64, num_classes)
    assert jnp.allclose(o1, reference(x1, w_t, b), atol=1e-5, rtol=1e-5)
    assert jnp.allclose(jnp.sum(o1, axis=1), 1.0, atol=1e-5)

    # 2) Large batch: multi-step pipelined grid with a ragged (masked) last block.
    x2 = jax.random.normal(k_x, (10000, input_dim), dtype=jnp.float32)
    o2 = jax.block_until_ready(model_c_to_y(x2, w_t, b, tm=2048))
    assert o2.shape == (10000, num_classes)
    assert jnp.allclose(o2, reference(x2, w_t, b), atol=1e-5, rtol=1e-5)
    assert jnp.allclose(jnp.sum(o2, axis=1), 1.0, atol=1e-5)

    # 3) Batch not a multiple of 8: exercises the <=7-row pad corner.
    x3 = jax.random.normal(k_x, (100, input_dim), dtype=jnp.float32)
    o3 = jax.block_until_ready(model_c_to_y(x3, w_t, b))
    assert o3.shape == (100, num_classes)
    assert jnp.allclose(o3, reference(x3, w_t, b), atol=1e-5, rtol=1e-5)

    # 4) Dims that don't lane-pack (8*D, 8*C not multiples of 128): generic
    #    row-wise kernel, also with a ragged final block and no batch pad.
    D2, C2 = 24, 12
    w2 = jax.random.uniform(k_w, (D2, C2), minval=-0.2, maxval=0.2, dtype=jnp.float32)
    b2 = jax.random.uniform(k_b, (C2,), minval=-0.2, maxval=0.2, dtype=jnp.float32)
    x4 = jax.random.normal(k_x, (100, D2), dtype=jnp.float32)
    o4 = jax.block_until_ready(model_c_to_y(x4, w2, b2, tm=64))
    assert o4.shape == (100, C2)
    assert jnp.allclose(o4, reference(x4, w2, b2), atol=1e-5, rtol=1e-5)

    print("KERNEL_OK")
</pallas_src>

<mosaic_0001>
module attributes {stable_mosaic.version = 11 : i64} {
  func.func @_packed_kernel(%arg0: i32, %arg1: memref<8x256xf32, #tpu.memory_space<vmem>>, %arg2: memref<256x128xf32, #tpu.memory_space<vmem>>, %arg3: memref<1x128xf32, #tpu.memory_space<vmem>>, %arg4: memref<128x128xf32, #tpu.memory_space<vmem>>, %arg5: memref<8x128xf32, #tpu.memory_space<vmem>>) attributes {dimension_semantics = [#tpu.dimension_semantics<parallel>], iteration_bounds = array<i64: 1>, scalar_prefetch = 0 : i64, scratch_operands = 0 : i64, tpu.core_type = #tpu.core_type<tc>, window_params = [{transform_indices = @transform_0, window_bounds = array<i64: 8, 256>}, {pipeline_mode = #tpu.pipeline_mode<synchronous>, transform_indices = @transform_1, window_bounds = array<i64: 256, 128>}, {pipeline_mode = #tpu.pipeline_mode<synchronous>, transform_indices = @transform_2, window_bounds = array<i64: 1, 128>}, {pipeline_mode = #tpu.pipeline_mode<synchronous>, transform_indices = @transform_3, window_bounds = array<i64: 128, 128>}, {transform_indices = @transform_4, window_bounds = array<i64: 8, 128>}]} {
    %c0 = arith.constant 0 : index
    %c0_0 = arith.constant 0 : index
    %0 = vector.load %arg1[%c0, %c0_0] : memref<8x256xf32, #tpu.memory_space<vmem>>, vector<8x256xf32>
    %c0_1 = arith.constant 0 : index
    %c0_2 = arith.constant 0 : index
    %1 = vector.load %arg2[%c0_1, %c0_2] : memref<256x128xf32, #tpu.memory_space<vmem>>, vector<256x128xf32>
    %cst = arith.constant dense<0.000000e+00> : vector<8x128xf32>
    %2 = tpu.matmul %0, %1, %cst {dimension_numbers = #tpu.dot_dimension_numbers<[1], [0], [0], [1], [0, 0, 1, 1], [], []>} : vector<8x256xf32>, vector<256x128xf32>, vector<8x128xf32> -> vector<8x128xf32>
    %c0_3 = arith.constant 0 : index
    %c0_4 = arith.constant 0 : index
    %3 = vector.load %arg3[%c0_3, %c0_4] : memref<1x128xf32, #tpu.memory_space<vmem>>, vector<1x128xf32>
    %4 = vector.broadcast %3 : vector<1x128xf32> to vector<8x128xf32>
    %5 = arith.addf %2, %4 : vector<8x128xf32>
    %cst_5 = arith.constant dense<0xFF800000> : vector<8xf32>
    %6 = vector.multi_reduction <maximumf>, %5, %cst_5 [1] : vector<8x128xf32> to vector<8xf32>
    %7 = vector.shape_cast %6 : vector<8xf32> to vector<8x1xf32>
    %8 = vector.broadcast %7 : vector<8x1xf32> to vector<8x128xf32>
    %9 = arith.subf %5, %8 : vector<8x128xf32>
    %10 = math.exp %9 : vector<8x128xf32>
    %c0_6 = arith.constant 0 : index
    %c0_7 = arith.constant 0 : index
    %11 = vector.load %arg4[%c0_6, %c0_7] : memref<128x128xf32, #tpu.memory_space<vmem>>, vector<128x128xf32>
    %cst_8 = arith.constant dense<0.000000e+00> : vector<8x128xf32>
    %12 = tpu.matmul %10, %11, %cst_8 {dimension_numbers = #tpu.dot_dimension_numbers<[1], [0], [0], [1], [0, 0, 1, 1], [], []>} : vector<8x128xf32>, vector<128x128xf32>, vector<8x128xf32> -> vector<8x128xf32>
    %13 = tpu.reciprocal %12 {approx = true} : vector<8x128xf32> -> vector<8x128xf32>
    %14 = arith.mulf %12, %13 : vector<8x128xf32>
    %cst_9 = arith.constant 2.000000e+00 : f32
    %15 = vector.broadcast %cst_9 : f32 to vector<8x128xf32>
    %16 = arith.subf %15, %14 : vector<8x128xf32>
    %17 = arith.mulf %13, %16 : vector<8x128xf32>
    %18 = arith.mulf %10, %17 : vector<8x128xf32>
    %c0_10 = arith.constant 0 : index
    %c0_11 = arith.constant 0 : index
    %19 = vector.load %arg5[%c0_10, %c0_11] : memref<8x128xf32, #tpu.memory_space<vmem>>, vector<8x128xf32>
    tpu.vector_store %arg5[%c0_10, %c0_11], %18 {strides = array<i32>} : memref<8x128xf32, #tpu.memory_space<vmem>>, vector<8x128xf32>,
    return
  }
  func.func @transform_0(%arg0: i32) -> (i32, i32) {
    %c0_i32 = arith.constant 0 : i32
    %c0_i32_0 = arith.constant 0 : i32
    return %arg0, %c0_i32 : i32, i32
  }
  func.func @transform_1(%arg0: i32) -> (i32, i32) {
    %c0_i32 = arith.constant 0 : i32
    %c0_i32_0 = arith.constant 0 : i32
    %c0_i32_1 = arith.constant 0 : i32
    return %c0_i32, %c0_i32_0 : i32, i32
  }
  func.func @transform_2(%arg0: i32) -> (i32, i32) {
    %c0_i32 = arith.constant 0 : i32
    %c0_i32_0 = arith.constant 0 : i32
    %c0_i32_1 = arith.constant 0 : i32
    return %c0_i32, %c0_i32_0 : i32, i32
  }
  func.func @transform_3(%arg0: i32) -> (i32, i32) {
    %c0_i32 = arith.constant 0 : i32
    %c0_i32_0 = arith.constant 0 : i32
    %c0_i32_1 = arith.constant 0 : i32
    return %c0_i32, %c0_i32_0 : i32, i32
  }
  func.func @transform_4(%arg0: i32) -> (i32, i32) {
    %c0_i32 = arith.constant 0 : i32
    %c0_i32_0 = arith.constant 0 : i32
    return %arg0, %c0_i32 : i32, i32
  }
}

</mosaic_0001>

<bundles_post_ra>
// kernel: tile.8
= control target key start
LH: loop header
LB: loop body
LE: loop exit
PB: predicated region body
PF: predicated region fallthrough
CT: control target
= control target key end

     0   :  { %s22_s0 = inlined_call_operand.vmem [shape: f32[16], index: 0, kind: input, shape index: {}]   ;;  %s23_s1 = inlined_call_operand.vmem [shape: f32[8,16], index: 1, kind: output, shape index: {}]  }
   0x1   :  { %v4_v0 = vld [vmem:[%s22_s0] ss:$0 sm:$0xff] }
   0x2   :  { %5 = vst [vmem:[%s23_s1] sm:$0xff] %v4_v0 }

// kernel: tile.9
= control target key start
LH: loop header
LB: loop body
LE: loop exit
PB: predicated region body
PF: predicated region fallthrough
CT: control target
= control target key end

     0   :  { %s67_s10 = smov 112   ;;  %s68_s11 = smov 80   ;;  %vm3_vm0 = vcmask 130048   ;;  %vm9_vm1 = vcmask 1048448   ;;  %vm15_vm2 = vcmask 917248   ;;  %vm21_vm3 = vcmask 786048   ;;  %s111_s0 = inlined_call_operand.vmem [shape: f32[8,16], index: 0, kind: input, shape index: {}]   ;;  %s112_s1 = inlined_call_operand.vmem [shape: f32[1,128], index: 1, kind: output, shape index: {}]  }
   0x1   :  { %v53_v0 = vld [vmem:[%s111_s0 + $0x7] sm:$0x1]   ;;  %v55_v1 = vld [vmem:[%s111_s0 + $0x5] sm:$0x1]   ;;  %v54_v2 = vld [vmem:[%s111_s0 + $0x6] sm:$0x1]  }
   0x2   :  { %7 = vrot.lane.b32.xlu0 %v53_v0, %s67_s10  ;;  %19 = vrot.lane.b32.xlu1 %v55_v1, %s68_s11  ;;  %v56_v3 = vld [vmem:[%s111_s0 + $0x4] sm:$0x1]   ;;  %v2_v4 = vld [vmem:[%s111_s0] sm:$0x1]   ;;  %s69_s18 = smov 96   ;;  %s70_s19 = smov 64  }
   0x3   :  { %4 = vst.msk [vmem:[#allocation0] sm:$0x1] %vm3_vm0, %v2_v4   ;;  %v57_v5 = vld [vmem:[%s111_s0 + $0x3] sm:$0x1]   ;;  %v58_v6 = vld [vmem:[%s111_s0 + $0x2] sm:$0x1]  }
   0x4   :  { %s71_s24 = smov 48   ;;  %s72_s25 = smov 32   ;;  %v59_v7 = vld [vmem:[%s111_s0 + $0x1] sm:$0x1]   ;;  %vm27_vm4 = vcmask 654848   ;;  %vm33_vm5 = vcmask 523648  }
   0x5   :  { %s73_s0 = smov 16   ;;  %vm39_vm6 = vcmask 392448   ;;  %vm45_vm7 = vcmask 261248  }
   0x6   :  { %13 = vrot.lane.b32.xlu0 %v54_v2, %s69_s18  ;;  %25 = vrot.lane.b32.xlu1 %v56_v3, %s70_s19 }
   0xa   :  { %31 = vrot.lane.b32.xlu0 %v57_v5, %s71_s24  ;;  %37 = vrot.lane.b32.xlu1 %v58_v6, %s72_s25 }
   0xe   :  { %43 = vrot.lane.b32.xlu0 %v59_v7, %s73_s0 }
  0x74   :  { %v8_v8 = vpop.permute.xlu0 %7   ;;  %v20_v9 = vpop.permute.xlu1 %19  }
  0x75   :  { %10 = vst.msk [vmem:[#allocation0] sm:$0x1] %vm9_vm1, %v8_v8  }
  0x78   :  { %v14_v10 = vpop.permute.xlu0 %13   ;;  %v26_v11 = vpop.permute.xlu1 %25  }
  0x79   :  { %16 = vst.msk [vmem:[#allocation0] sm:$0x1] %vm15_vm2, %v14_v10  }
  0x7a   :  { %22 = vst.msk [vmem:[#allocation0] sm:$0x1] %vm21_vm3, %v20_v9  }
  0x7b   :  { %28 = vst.msk [vmem:[#allocation0] sm:$0x1] %vm27_vm4, %v26_v11  }
  0x7c   :  { %v32_v12 = vpop.permute.xlu0 %31   ;;  %v38_v13 = vpop.permute.xlu1 %37  }
  0x7d   :  { %34 = vst.msk [vmem:[#allocation0] sm:$0x1] %vm33_vm5, %v32_v12  }
  0x7e   :  { %40 = vst.msk [vmem:[#allocation0] sm:$0x1] %vm39_vm6, %v38_v13  }
  0x80   :  { %v44_v14 = vpop.permute.xlu0 %43  }
  0x81   :  { %46 = vst.msk [vmem:[#allocation0] sm:$0x1] %vm45_vm7, %v44_v14  }
  0x88   :  { %v50_v15 = vld [vmem:[#allocation0] sm:$0x1] }
  0x89   :  { %52 = vst [vmem:[%s112_s1] sm:$0x1] %v50_v15 }

// kernel: model_c_to_y.1
= control target key start
LH: loop header
LB: loop body
LE: loop exit
PB: predicated region body
PF: predicated region fallthrough
CT: control target
= control target key end

     0   :  { %v380_v50 = vmov 0.0|0.0   ;;  %vm381_vm0 = vmmov 0   ;;  %s564_s1 = inlined_call_operand.vmem [shape: f32[256,128], index: 1, kind: input, shape index: {}]   ;;  %s565_s0 = inlined_call_operand.vmem [shape: f32[8,256], index: 0, kind: input, shape index: {}]   ;;  %s566_s3 = inlined_call_operand.vmem [shape: f32[128,128], index: 3, kind: input, shape index: {}]   ;;  %s567_s2 = inlined_call_operand.vmem [shape: f32[1,128], index: 2, kind: input, shape index: {}]   ;;  %s568_s4 = inlined_call_operand.vmem [shape: f32[8,128], index: 4, kind: output, shape index: {}]  }
   0x1   :  { %v35_v0 = vld [vmem:[%s564_s1 + $0x80] sm:$0xff]  ;;  %v36_v1 = vld [vmem:[%s564_s1 + $0x88] sm:$0xff]  ;;  %v37_v5 = vld [vmem:[%s564_s1 + $0x90] sm:$0xff]  ;;  %349 = vmatprep.subr.bf16.mxu1 %v380_v50 }
   0x2   :  { %v19_v2 = vld [vmem:[%s564_s1] sm:$0xff]  ;;  %v317_v3 = vpack.c.bf16 %v36_v1, %v35_v0  ;;  %v20_v4 = vld [vmem:[%s564_s1 + $0x8] sm:$0xff]  ;;  %v38_v6 = vld [vmem:[%s564_s1 + $0x98] sm:$0xff] }
   0x3   :  { %v319_v7 = vpack.c.bf16 %v20_v4, %v19_v2  ;;  %v321_v8 = vpack.c.bf16 %v38_v6, %v37_v5  ;;  %v21_v9 = vld [vmem:[%s564_s1 + $0x10] sm:$0xff]  ;;  %v22_v10 = vld [vmem:[%s564_s1 + $0x18] sm:$0xff]  ;;  %v39_v11 = vld [vmem:[%s564_s1 + $0xa0] sm:$0xff] }
   0x4   :  { %318 = vmatprep.subr.bf16.mxu0 %v317_v3  ;;  %v40_v12 = vld [vmem:[%s564_s1 + $0xa8] sm:$0xff]  ;;  %v323_v13 = vpack.c.bf16 %v22_v10, %v21_v9  ;;  %v23_v15 = vld [vmem:[%s564_s1 + $0x20] sm:$0xff]  ;;  %v41_v17 = vld [vmem:[%s564_s1 + $0xb0] sm:$0xff] }
   0x5   :  { %320 = vmatpush3.bf16.msra.mxu0 %v319_v7  ;;  %v325_v14 = vpack.c.bf16 %v40_v12, %v39_v11  ;;  %v24_v16 = vld [vmem:[%s564_s1 + $0x28] sm:$0xff]  ;;  %v42_v18 = vld [vmem:[%s564_s1 + $0xb8] sm:$0xff]  ;;  %v25_v21 = vld [vmem:[%s564_s1 + $0x30] sm:$0xff] }
   0x6   :  { %322 = vmatprep.subr.bf16.mxu0 %v321_v8  ;;  %v327_v19 = vpack.c.bf16 %v24_v16, %v23_v15  ;;  %v329_v20 = vpack.c.bf16 %v42_v18, %v41_v17  ;;  %v26_v22 = vld [vmem:[%s564_s1 + $0x38] sm:$0xff]  ;;  %v43_v23 = vld [vmem:[%s564_s1 + $0xc0] sm:$0xff]  ;;  %v44_v24 = vld [vmem:[%s564_s1 + $0xc8] sm:$0xff]  ;;  %v382_v15 = vmov 0.0  }
   0x7   :  { %v18_v25 = vld [vmem:[%s565_s0 + $0x8] sm:$0xff]  ;;  %v331_v26 = vpack.c.bf16 %v26_v22, %v25_v21  ;;  %v333_v27 = vpack.c.bf16 %v44_v24, %v43_v23  ;;  %v27_v28 = vld [vmem:[%s564_s1 + $0x40] sm:$0xff]  ;;  %v45_v30 = vld [vmem:[%s564_s1 + $0xd0] sm:$0xff]  ;;  %314 = vmatprep.mubr.msk.f32.mxu1 %vm381_vm0, %v382_v15 }
   0x8   :  { %122 = vmatprep.mubr.f32.mxu0 %v18_v25  ;;  %v28_v29 = vld [vmem:[%s564_s1 + $0x48] sm:$0xff]  ;;  %v46_v31 = vld [vmem:[%s564_s1 + $0xd8] sm:$0xff]  ;;  %v29_v34 = vld [vmem:[%s564_s1 + $0x50] sm:$0xff] }
   0x9   :  { %324 = vmatpush3.bf16.msra.mxu0 %v323_v13  ;;  %v335_v32 = vpack.c.bf16 %v28_v29, %v27_v28  ;;  %v337_v33 = vpack.c.bf16 %v46_v31, %v45_v30  ;;  %v30_v35 = vld [vmem:[%s564_s1 + $0x58] sm:$0xff]  ;;  %v47_v36 = vld [vmem:[%s564_s1 + $0xe0] sm:$0xff]  ;;  %v48_v37 = vld [vmem:[%s564_s1 + $0xe8] sm:$0xff] }
   0xa   :  { %326 = vmatprep.subr.bf16.mxu0 %v325_v14  ;;  %v339_v38 = vpack.c.bf16 %v30_v35, %v29_v34  ;;  %v341_v39 = vpack.c.bf16 %v48_v37, %v47_v36  ;;  %v31_v40 = vld [vmem:[%s564_s1 + $0x60] sm:$0xff]  ;;  %v32_v41 = vld [vmem:[%s564_s1 + $0x68] sm:$0xff]  ;;  %v49_v42 = vld [vmem:[%s564_s1 + $0xf0] sm:$0xff] }
   0xb   :  { %v50_v43 = vld [vmem:[%s564_s1 + $0xf8] sm:$0xff]  ;;  %v343_v44 = vpack.c.bf16 %v32_v41, %v31_v40  ;;  %v33_v46 = vld [vmem:[%s564_s1 + $0x70] sm:$0xff]  ;;  %v17_v49 = vld [vmem:[%s565_s0] sm:$0xff] }
   0xc   :  { %v345_v45 = vpack.c.bf16 %v50_v43, %v49_v42  ;;  %v34_v47 = vld [vmem:[%s564_s1 + $0x78] sm:$0xff]  ;;  %v133_v51 = vld [vmem:[%s566_s3] sm:$0xff]  ;;  %v134_v52 = vld [vmem:[%s566_s3 + $0x8] sm:$0xff] }
   0xd   :  { %328 = vmatpush3.bf16.msra.mxu0 %v327_v19  ;;  %v347_v48 = vpack.c.bf16 %v34_v47, %v33_v46  ;;  %v135_v53 = vld [vmem:[%s566_s3 + $0x10] sm:$0xff]  ;;  %v350_v54 = vpack.c.bf16 %v134_v52, %v133_v51  ;;  %v136_v55 = vld [vmem:[%s566_s3 + $0x18] sm:$0xff]  ;;  %v137_v57 = vld [vmem:[%s566_s3 + $0x20] sm:$0xff] }
   0xe   :  { %330 = vmatprep.subr.bf16.mxu0 %v329_v20  ;;  %v353_v56 = vpack.c.bf16 %v136_v55, %v135_v53  ;;  %v138_v58 = vld [vmem:[%s566_s3 + $0x28] sm:$0xff]  ;;  %v139_v60 = vld [vmem:[%s566_s3 + $0x30] sm:$0xff]  ;;  %v140_v61 = vld [vmem:[%s566_s3 + $0x38] sm:$0xff] }
   0xf   :  { %351 = vmatpush3.bf16.msra.mxu1 %v350_v54  ;;  %v356_v59 = vpack.c.bf16 %v138_v58, %v137_v57  ;;  %v359_v62 = vpack.c.bf16 %v140_v61, %v139_v60  ;;  %v229_v1 = vld [vmem:[%s567_s2] ss:$0 sm:$0xff]  ;;  %v142_v5 = vld [vmem:[%s566_s3 + $0x48] sm:$0xff]  ;;  %v143_v7 = vld [vmem:[%s566_s3 + $0x50] sm:$0xff] }
  0x10   :  { %352 = vmatprep.subr.bf16.mxu1 %v380_v50  ;;  %v141_v4 = vld [vmem:[%s566_s3 + $0x40] sm:$0xff]  ;;  %v144_v8 = vld [vmem:[%s566_s3 + $0x58] sm:$0xff]  ;;  %v146_v11 = vld [vmem:[%s566_s3 + $0x68] sm:$0xff] }
  0x11   :  { %332 = vmatpush3.bf16.msra.mxu0 %v331_v26  ;;  %v362_v6 = vpack.c.bf16 %v142_v5, %v141_v4  ;;  %v365_v9 = vpack.c.bf16 %v144_v8, %v143_v7  ;;  %v145_v10 = vld [vmem:[%s566_s3 + $0x60] sm:$0xff]  ;;  %v147_v13 = vld [vmem:[%s566_s3 + $0x70] sm:$0xff]  ;;  %v148_v14 = vld [vmem:[%s566_s3 + $0x78] sm:$0xff] }
  0x12   :  { %334 = vmatprep.subr.bf16.mxu0 %v333_v27  ;;  %v368_v12 = vpack.c.bf16 %v146_v11, %v145_v10  ;;  %v371_v16 = vpack.c.bf16 %v148_v14, %v147_v13 }
  0x13   :  { %354 = vmatpush3.bf16.msra.mxu1 %v353_v56 }
  0x14   :  { %355 = vmatprep.subr.bf16.mxu1 %v380_v50 }
  0x15   :  { %336 = vmatpush3.bf16.msra.mxu0 %v335_v32 }
  0x16   :  { %338 = vmatprep.subr.bf16.mxu0 %v337_v33 }
  0x17   :  { %357 = vmatpush3.bf16.msra.mxu1 %v356_v59 }
  0x18   :  { %358 = vmatprep.subr.bf16.mxu1 %v380_v50 }
  0x19   :  { %340 = vmatpush3.bf16.msra.mxu0 %v339_v38 }
  0x1a   :  { %342 = vmatprep.subr.bf16.mxu0 %v341_v39 }
  0x1b   :  { %360 = vmatpush3.bf16.msra.mxu1 %v359_v62 }
  0x1c   :  { %361 = vmatprep.subr.bf16.mxu1 %v380_v50 }
  0x1d   :  { %344 = vmatpush3.bf16.msra.mxu0 %v343_v44 }
  0x1e   :  { %346 = vmatprep.subr.bf16.mxu0 %v345_v45 }
  0x1f   :  { %363 = vmatpush3.bf16.msra.mxu1 %v362_v6 }
  0x20   :  { %364 = vmatprep.subr.bf16.mxu1 %v380_v50 }
  0x21   :  { %348 = vmatpush3.bf16.msra.mxu0 %v347_v48 }
  0x23   :  { %366 = vmatpush3.bf16.msra.mxu1 %v365_v9 }
  0x24   :  { %123 = vmatmul.mubr.f32.vlgmr.msra.gmra.mrb[0].mxu0 %v17_v49  ;;  %367 = vmatprep.subr.bf16.mxu1 %v380_v50 }
  0x27   :  { %369 = vmatpush3.bf16.msra.mxu1 %v368_v12 }
  0x28   :  { %370 = vmatprep.subr.bf16.mxu1 %v380_v50 }
  0x2b   :  { %372 = vmatpush3.bf16.msra.mxu1 %v371_v16 }
  0xf7   :  { %v262_v63 = vpop.f32.mrb[0].mxu0 }
  0xf8   :  { %v263_v0 = vpop.f32.mrb[1].mxu0 }
  0xf9   :  { %v264_v2 = vadd.f32 %v263_v0, %v262_v63 }
  0xfb   :  { %v125_v3 = vadd.f32 %v264_v2, %v229_v1 }
  0xfd   :  { %128 = vmax.xlane.f32.xlu0 %v125_v3 }
 0x18a   :  { %v129_v17 = vpop.xlane.xlu0 %128 }
 0x18b   :  { %v130_v18 = vsub.f32 %v125_v3, %v129_v17 }
 0x18d   :  { %v131_v19 = vmul.f32 1.442695, %v130_v18 }
 0x18f   :  { %376 = vpow2.f32 %v131_v19 }
 0x199   :  { %v377_v20 = vpop.eup %376 }
 0x19a   :  { %315 = vmatmul.mubr.f32.vlgmr.msra.gmra.mrb[0].mxu1 %v377_v20 }
 0x26d   :  { %v215_v21 = vpop.f32.mrb[0].mxu1 }
 0x26e   :  { %378 = vrcp.f32 %v215_v21  ;;  %v316_v22 = vpop.f32.mrb[1].mxu1 }
 0x278   :  { %v379_v23 = vpop.eup %378 }
 0x279   :  { %v220_v24 = vmul.f32 %v379_v23, %v215_v21 }
 0x27b   :  { %v221_v25 = vsub.f32 2.0, %v220_v24 }
 0x27d   :  { %v222_v26 = vmul.f32 %v379_v23, %v221_v25 }
 0x27f   :  { %v223_v27 = vmul.f32 %v377_v20, %v222_v26 }
 0x281   :  { %224 = vst [vmem:[%s568_s4] sm:$0xff] %v223_v27 }

</bundles_post_ra>
